<compile_context>
chip_gen: v7x
topology: tpu7x:2x2x1
jax: 0.10.0
libtpu: 0.0.40
codegen_flags: <defaults>
</compile_context>

<pallas_src>
import jax
import jax.numpy as jnp
from jax.experimental import pallas as pl
from jax.experimental.pallas import tpu as pltpu

STATE_SIZE = 9
ACTION_SIZE = 9
HIDDEN = 16

MAX_TILE_B = 4096   # max rows per grid step; per-step data is tiny (<1 MiB) so big
                    # tiles amortize the ~0.35us/step overhead.
MIN_SPLIT_B = 512   # batches >= this get >=2 (even) grid steps so the "parallel"
                    # batch axis balances across v7x's two TensorCores.


def qnn_kernel(x_ref, w1_ref, b1_ref, w2_ref, b2_ref, w3_ref, b3_ref, o_ref):
    # x_ref : (tb, 9)   batch tile of board states
    # w*/b* : un-padded Linear params (VMEM-resident across the grid)
    # o_ref : (tb, 9)   real-width output tile (no padded lanes to write back)
    x = x_ref[...]

    # fc1 + ReLU
    h1 = jnp.dot(x, w1_ref[...], preferred_element_type=jnp.float32) + b1_ref[...]
    h1 = jnp.maximum(h1, 0.0)

    # fc2 + ReLU
    h2 = jnp.dot(h1, w2_ref[...], preferred_element_type=jnp.float32) + b2_ref[...]
    h2 = jnp.maximum(h2, 0.0)

    # fc3 (no activation)
    o_ref[...] = (
        jnp.dot(h2, w3_ref[...], preferred_element_type=jnp.float32) + b3_ref[...]
    ).astype(o_ref.dtype)


def _round_up(n, m):
    return ((n + m - 1) // m) * m


def _choose_tiling(batch):
    """Pick (tile_rows, padded_batch, n_steps) for the 1-D batch grid."""
    n_steps = pl.cdiv(batch, MAX_TILE_B)
    if batch >= MIN_SPLIT_B and n_steps < 2:
        n_steps = 2                      # give both v7x TensorCores work
    if n_steps > 1 and n_steps % 2 == 1:
        n_steps += 1                     # even step count -> balanced megacore split
    tb = _round_up(pl.cdiv(batch, n_steps), 8)   # sublane-aligned tile rows
    return tb, tb * n_steps, n_steps


@jax.jit
def qnn_forward(x, params):
    """x: (B, STATE_SIZE) f32.  params: dict w1,b1,w2,b2,w3,b3 (weights as (in, out))."""
    B = x.shape[0]
    tb, b_pad, n_steps = _choose_tiling(B)
    if b_pad != B:
        x = jnp.pad(x, ((0, b_pad - B), (0, 0)))

    flops = 2 * b_pad * (STATE_SIZE * HIDDEN + HIDDEN * HIDDEN + HIDDEN * ACTION_SIZE)
    param_bytes = 4 * (STATE_SIZE * HIDDEN + HIDDEN
                       + HIDDEN * HIDDEN + HIDDEN
                       + HIDDEN * ACTION_SIZE + ACTION_SIZE)
    bytes_accessed = 4 * b_pad * (STATE_SIZE + ACTION_SIZE) + param_bytes

    resident = lambda i: (0, 0)   # weights/biases: same block every step -> VMEM-resident

    out_padded = pl.pallas_call(
        qnn_kernel,
        out_shape=jax.ShapeDtypeStruct((b_pad, ACTION_SIZE), jnp.float32),
        grid=(n_steps,),
        in_specs=[
            pl.BlockSpec((tb, STATE_SIZE), lambda i: (i, 0)),      # x: tiled over batch
            pl.BlockSpec((STATE_SIZE, HIDDEN), resident),          # w1
            pl.BlockSpec((1, HIDDEN), resident),                   # b1
            pl.BlockSpec((HIDDEN, HIDDEN), resident),              # w2
            pl.BlockSpec((1, HIDDEN), resident),                   # b2
            pl.BlockSpec((HIDDEN, ACTION_SIZE), resident),         # w3
            pl.BlockSpec((1, ACTION_SIZE), resident),              # b3
        ],
        out_specs=pl.BlockSpec((tb, ACTION_SIZE), lambda i: (i, 0)),
        compiler_params=pltpu.CompilerParams(
            dimension_semantics=("parallel",),
            vmem_limit_bytes=32 << 20,   # headroom on v5e (16 MiB default scoped)
        ),
        cost_estimate=pl.CostEstimate(
            flops=flops, transcendentals=0, bytes_accessed=bytes_accessed),
    )(x, params["w1"], params["b1"], params["w2"], params["b2"],
      params["w3"], params["b3"])

    # Only batch padding to drop — the feature dim is already the real 9 columns.
    return out_padded[:B]


def init_params(key):
    """Deterministic init matching nn.Linear shapes (weights stored as (in, out))."""
    k1, k2, k3, k4, k5, k6 = jax.random.split(key, 6)
    s1 = 1.0 / jnp.sqrt(STATE_SIZE)
    s2 = 1.0 / jnp.sqrt(HIDDEN)
    return {
        "w1": jax.random.uniform(k1, (STATE_SIZE, HIDDEN), jnp.float32, -s1, s1),
        "b1": jax.random.uniform(k2, (1, HIDDEN), jnp.float32, -s1, s1),
        "w2": jax.random.uniform(k3, (HIDDEN, HIDDEN), jnp.float32, -s2, s2),
        "b2": jax.random.uniform(k4, (1, HIDDEN), jnp.float32, -s2, s2),
        "w3": jax.random.uniform(k5, (HIDDEN, ACTION_SIZE), jnp.float32, -s2, s2),
        "b3": jax.random.uniform(k6, (1, ACTION_SIZE), jnp.float32, -s2, s2),
    }


def reference_forward(x, p):
    h1 = jnp.maximum(x @ p["w1"] + p["b1"], 0.0)
    h2 = jnp.maximum(h1 @ p["w2"] + p["b2"], 0.0)
    return h2 @ p["w3"] + p["b3"]


if __name__ == "__main__":
    key = jax.random.PRNGKey(0)
    kx, kp = jax.random.split(key)
    params = init_params(kp)

    # Small inference batch of tic-tac-toe board states (cells in {-1, 0, 1}).
    B = 8
    x = jax.random.randint(kx, (B, STATE_SIZE), -1, 2).astype(jnp.float32)
    out = jax.block_until_ready(qnn_forward(x, params))
    ref = reference_forward(x, params)
    assert out.shape == (B, ACTION_SIZE)
    assert jnp.allclose(out, ref, atol=1e-5, rtol=1e-5)

    # Batch not a multiple of the 8-row sublane tile (exercises batch padding).
    B2 = 20
    x2 = jax.random.randint(jax.random.PRNGKey(1), (B2, STATE_SIZE), -1, 2).astype(jnp.float32)
    out2 = jax.block_until_ready(qnn_forward(x2, params))
    assert out2.shape == (B2, ACTION_SIZE)
    assert jnp.allclose(out2, reference_forward(x2, params), atol=1e-5, rtol=1e-5)

    # Batch large enough to use >= 2 grid steps (megacore-split / pipelined path).
    B3 = 600
    x3 = jax.random.randint(jax.random.PRNGKey(2), (B3, STATE_SIZE), -1, 2).astype(jnp.float32)
    out3 = jax.block_until_ready(qnn_forward(x3, params))
    assert out3.shape == (B3, ACTION_SIZE)
    assert jnp.allclose(out3, reference_forward(x3, params), atol=1e-4, rtol=1e-5)

    print("KERNEL_OK")
</pallas_src>

<mosaic_0001>
module attributes {stable_mosaic.version = 11 : i64} {
  func.func @qnn_kernel(%arg0: i32, %arg1: memref<8x9xf32, #tpu.memory_space<vmem>>, %arg2: memref<9x16xf32, #tpu.memory_space<vmem>>, %arg3: memref<1x16xf32, #tpu.memory_space<vmem>>, %arg4: memref<16x16xf32, #tpu.memory_space<vmem>>, %arg5: memref<1x16xf32, #tpu.memory_space<vmem>>, %arg6: memref<16x9xf32, #tpu.memory_space<vmem>>, %arg7: memref<1x9xf32, #tpu.memory_space<vmem>>, %arg8: memref<8x9xf32, #tpu.memory_space<vmem>>) attributes {dimension_semantics = [#tpu.dimension_semantics<parallel>], iteration_bounds = array<i64: 1>, scalar_prefetch = 0 : i64, scratch_operands = 0 : i64, tpu.core_type = #tpu.core_type<tc>, window_params = [{transform_indices = @transform_0, window_bounds = array<i64: 8, 9>}, {pipeline_mode = #tpu.pipeline_mode<synchronous>, transform_indices = @transform_1, window_bounds = array<i64: 9, 16>}, {pipeline_mode = #tpu.pipeline_mode<synchronous>, transform_indices = @transform_2, window_bounds = array<i64: 1, 16>}, {pipeline_mode = #tpu.pipeline_mode<synchronous>, transform_indices = @transform_3, window_bounds = array<i64: 16, 16>}, {pipeline_mode = #tpu.pipeline_mode<synchronous>, transform_indices = @transform_4, window_bounds = array<i64: 1, 16>}, {pipeline_mode = #tpu.pipeline_mode<synchronous>, transform_indices = @transform_5, window_bounds = array<i64: 16, 9>}, {pipeline_mode = #tpu.pipeline_mode<synchronous>, transform_indices = @transform_6, window_bounds = array<i64: 1, 9>}, {transform_indices = @transform_7, window_bounds = array<i64: 8, 9>}]} {
    %c0 = arith.constant 0 : index
    %c0_0 = arith.constant 0 : index
    %0 = vector.load %arg1[%c0, %c0_0] : memref<8x9xf32, #tpu.memory_space<vmem>>, vector<8x9xf32>
    %c0_1 = arith.constant 0 : index
    %c0_2 = arith.constant 0 : index
    %1 = vector.load %arg2[%c0_1, %c0_2] : memref<9x16xf32, #tpu.memory_space<vmem>>, vector<9x16xf32>
    %cst = arith.constant dense<0.000000e+00> : vector<8x16xf32>
    %2 = tpu.matmul %0, %1, %cst {dimension_numbers = #tpu.dot_dimension_numbers<[1], [0], [0], [1], [0, 0, 1, 1], [], []>} : vector<8x9xf32>, vector<9x16xf32>, vector<8x16xf32> -> vector<8x16xf32>
    %c0_3 = arith.constant 0 : index
    %c0_4 = arith.constant 0 : index
    %3 = vector.load %arg3[%c0_3, %c0_4] : memref<1x16xf32, #tpu.memory_space<vmem>>, vector<1x16xf32>
    %4 = vector.broadcast %3 : vector<1x16xf32> to vector<8x16xf32>
    %5 = arith.addf %2, %4 : vector<8x16xf32>
    %cst_5 = arith.constant 0.000000e+00 : f32
    %6 = vector.broadcast %cst_5 : f32 to vector<8x16xf32>
    %7 = arith.maximumf %5, %6 : vector<8x16xf32>
    %c0_6 = arith.constant 0 : index
    %c0_7 = arith.constant 0 : index
    %8 = vector.load %arg4[%c0_6, %c0_7] : memref<16x16xf32, #tpu.memory_space<vmem>>, vector<16x16xf32>
    %cst_8 = arith.constant dense<0.000000e+00> : vector<8x16xf32>
    %9 = tpu.matmul %7, %8, %cst_8 {dimension_numbers = #tpu.dot_dimension_numbers<[1], [0], [0], [1], [0, 0, 1, 1], [], []>} : vector<8x16xf32>, vector<16x16xf32>, vector<8x16xf32> -> vector<8x16xf32>
    %c0_9 = arith.constant 0 : index
    %c0_10 = arith.constant 0 : index
    %10 = vector.load %arg5[%c0_9, %c0_10] : memref<1x16xf32, #tpu.memory_space<vmem>>, vector<1x16xf32>
    %11 = vector.broadcast %10 : vector<1x16xf32> to vector<8x16xf32>
    %12 = arith.addf %9, %11 : vector<8x16xf32>
    %cst_11 = arith.constant 0.000000e+00 : f32
    %13 = vector.broadcast %cst_11 : f32 to vector<8x16xf32>
    %14 = arith.maximumf %12, %13 : vector<8x16xf32>
    %c0_12 = arith.constant 0 : index
    %c0_13 = arith.constant 0 : index
    %15 = vector.load %arg6[%c0_12, %c0_13] : memref<16x9xf32, #tpu.memory_space<vmem>>, vector<16x9xf32>
    %cst_14 = arith.constant dense<0.000000e+00> : vector<8x9xf32>
    %16 = tpu.matmul %14, %15, %cst_14 {dimension_numbers = #tpu.dot_dimension_numbers<[1], [0], [0], [1], [0, 0, 1, 1], [], []>} : vector<8x16xf32>, vector<16x9xf32>, vector<8x9xf32> -> vector<8x9xf32>
    %c0_15 = arith.constant 0 : index
    %c0_16 = arith.constant 0 : index
    %17 = vector.load %arg7[%c0_15, %c0_16] : memref<1x9xf32, #tpu.memory_space<vmem>>, vector<1x9xf32>
    %18 = vector.broadcast %17 : vector<1x9xf32> to vector<8x9xf32>
    %19 = arith.addf %16, %18 : vector<8x9xf32>
    %c0_17 = arith.constant 0 : index
    %c0_18 = arith.constant 0 : index
    %20 = vector.load %arg8[%c0_17, %c0_18] : memref<8x9xf32, #tpu.memory_space<vmem>>, vector<8x9xf32>
    tpu.vector_store %arg8[%c0_17, %c0_18], %19 {strides = array<i32>} : memref<8x9xf32, #tpu.memory_space<vmem>>, vector<8x9xf32>,
    return
  }
  func.func @transform_0(%arg0: i32) -> (i32, i32) {
    %c0_i32 = arith.constant 0 : i32
    %c0_i32_0 = arith.constant 0 : i32
    return %arg0, %c0_i32 : i32, i32
  }
  func.func @transform_1(%arg0: i32) -> (i32, i32) {
    %c0_i32 = arith.constant 0 : i32
    %c0_i32_0 = arith.constant 0 : i32
    %c0_i32_1 = arith.constant 0 : i32
    return %c0_i32, %c0_i32_0 : i32, i32
  }
  func.func @transform_2(%arg0: i32) -> (i32, i32) {
    %c0_i32 = arith.constant 0 : i32
    %c0_i32_0 = arith.constant 0 : i32
    %c0_i32_1 = arith.constant 0 : i32
    return %c0_i32, %c0_i32_0 : i32, i32
  }
  func.func @transform_3(%arg0: i32) -> (i32, i32) {
    %c0_i32 = arith.constant 0 : i32
    %c0_i32_0 = arith.constant 0 : i32
    %c0_i32_1 = arith.constant 0 : i32
    return %c0_i32, %c0_i32_0 : i32, i32
  }
  func.func @transform_4(%arg0: i32) -> (i32, i32) {
    %c0_i32 = arith.constant 0 : i32
    %c0_i32_0 = arith.constant 0 : i32
    %c0_i32_1 = arith.constant 0 : i32
    return %c0_i32, %c0_i32_0 : i32, i32
  }
  func.func @transform_5(%arg0: i32) -> (i32, i32) {
    %c0_i32 = arith.constant 0 : i32
    %c0_i32_0 = arith.constant 0 : i32
    %c0_i32_1 = arith.constant 0 : i32
    return %c0_i32, %c0_i32_0 : i32, i32
  }
  func.func @transform_6(%arg0: i32) -> (i32, i32) {
    %c0_i32 = arith.constant 0 : i32
    %c0_i32_0 = arith.constant 0 : i32
    %c0_i32_1 = arith.constant 0 : i32
    return %c0_i32, %c0_i32_0 : i32, i32
  }
  func.func @transform_7(%arg0: i32) -> (i32, i32) {
    %c0_i32 = arith.constant 0 : i32
    %c0_i32_0 = arith.constant 0 : i32
    return %arg0, %c0_i32 : i32, i32
  }
}

</mosaic_0001>

<bundles_post_ra>
// kernel: qnn_forward.1
= control target key start
LH: loop header
LB: loop body
LE: loop exit
PB: predicated region body
PF: predicated region fallthrough
CT: control target
= control target key end

     0   :  { %12 = vsyncpa [#allocation3], 0  ;;  %s658_s0 = inlined_call_operand.hbm [shape: f32[8,9], index: 0, kind: input, shape index: {}]   ;;  %s659_s1 = inlined_call_operand.hbm [shape: f32[9,16], index: 1, kind: input, shape index: {}]   ;;  %s660_s2 = inlined_call_operand.vmem [shape: f32[1,16], index: 2, kind: input, shape index: {}]   ;;  %s661_s3 = inlined_call_operand.vmem [shape: f32[16,16], index: 3, kind: input, shape index: {}]   ;;  %s662_s4 = inlined_call_operand.vmem [shape: f32[1,16], index: 4, kind: input, shape index: {}]   ;;  %s663_s5 = inlined_call_operand.hbm [shape: f32[16,9], index: 5, kind: input, shape index: {}]   ;;  %s664_s6 = inlined_call_operand.hbm [shape: f32[1,9], index: 6, kind: input, shape index: {}]   ;;  %s665_s7 = inlined_call_operand.hbm [shape: f32[8,9], index: 7, kind: output, shape index: {}]  }
   0x1   :  { %13 = vsyncpa [#allocation6], 0 }
   0x2   :  { %14 = vsyncpa [#allocation9], 0 }
   0x3   :  { %15 = vsyncpa [#allocation4], 0  ;;  %s527_s24 = smov [#allocation5]   ;;  %s409_s28 = scalar_lea.hbm %s659_s1, 256 }
   0x4   :  { %s31_s25 = sshll.u32 %s527_s24, 4  ;;  %p410_p0 = scmp.ne.s32.totalorder %s659_s1, %s409_s28  ;;  %s32_s25 = int_to_ptr.vmem [resolvable:$true] %s31_s25 }
   0x5   :  { %p413_p1 = scmp.lt.u32.totalorder %s409_s28, %s659_s1 }
   0x7   :  { %p415_p2 = pnand %p413_p1, %p410_p0 }
   0x9   :  { %418 = shalt.err (!%p415_p2)
}
   0xa   :  { %s419_s10 = scalar_lea.vmem %s32_s25, 256  ;;  %p424_p4 = scmp.lt.s32.totalorder %s32_s25, %s32_s25 }
   0xb   :  { %p420_p3 = scmp.ne.s32.totalorder %s32_s25, %s419_s10  ;;  %p425_p5 = scmp.lt.s32.totalorder %s419_s10, %s419_s10 }
   0xd   :  { %p426_p6 = por %p425_p5, %p424_p4 }
   0xf   :  { %p427_p7 = pnand %p426_p6, %p420_p3 }
  0x11   :  { %430 = shalt.err (!%p427_p7)
}
  0x12   :  { %s528_s11 = smov 128   ;;  %s529_s12 = smov 8  }
  0x13   :  { %37 = dma.hbm_to_vmem [thread:$0]  %s659_s1, 256, %s32_s25, [#allocation6], %s528_s11, %s528_s11, %s529_s12  }
  0x14   :  { %s530_s15 = smov [#allocation2]   ;;  %s531_s17 = smov [#allocation7]  }
  0x15   :  { %s22_s16 = sshll.u32 %s530_s15, 4  ;;  %s49_s18 = sshll.u32 %s531_s17, 4  ;;  %s23_s16 = int_to_ptr.vmem [resolvable:$true] %s22_s16  ;;  %s50_s18 = int_to_ptr.vmem [resolvable:$true] %s49_s18 }
  0x16   :  { %s431_s21 = scalar_lea.hbm %s658_s0, 128 }
  0x17   :  { %p432_p8 = scmp.ne.s32.totalorder %s658_s0, %s431_s21  ;;  %p435_p9 = scmp.lt.u32.totalorder %s431_s21, %s658_s0 }
  0x19   :  { %p437_p10 = pnand %p435_p9, %p432_p8 }
  0x1b   :  { %440 = shalt.err (!%p437_p10)
}
  0x1c   :  { %s441_s1 = scalar_lea.vmem %s23_s16, 128  ;;  %p446_p12 = scmp.lt.s32.totalorder %s23_s16, %s23_s16 }
  0x1d   :  { %p442_p11 = scmp.ne.s32.totalorder %s23_s16, %s441_s1  ;;  %p447_p13 = scmp.lt.s32.totalorder %s441_s1, %s441_s1 }
  0x1f   :  { %p448_p0 = por %p447_p13, %p446_p12 }
  0x21   :  { %p449_p1 = pnand %p448_p0, %p442_p11 }
  0x23   :  { %452 = shalt.err (!%p449_p1)
}
  0x24   :  { %25 = dma.hbm_to_vmem [thread:$0]  %s658_s0, 128, %s23_s16, [#allocation3]  }
  0x25   :  { %s453_s30 = scalar_lea.hbm %s663_s5, 256 }
  0x26   :  { %p454_p2 = scmp.ne.s32.totalorder %s663_s5, %s453_s30  ;;  %p457_p3 = scmp.lt.u32.totalorder %s453_s30, %s663_s5 }
  0x28   :  { %p459_p4 = pnand %p457_p3, %p454_p2 }
  0x2a   :  { %462 = shalt.err (!%p459_p4)
}
  0x2b   :  { %s463_s14 = scalar_lea.vmem %s50_s18, 256  ;;  %p468_p6 = scmp.lt.s32.totalorder %s50_s18, %s50_s18 }
  0x2c   :  { %p464_p5 = scmp.ne.s32.totalorder %s50_s18, %s463_s14  ;;  %p469_p7 = scmp.lt.s32.totalorder %s463_s14, %s463_s14 }
  0x2e   :  { %p470_p8 = por %p469_p7, %p468_p6 }
  0x30   :  { %p471_p9 = pnand %p470_p8, %p464_p5 }
  0x32   :  { %474 = shalt.err (!%p471_p9)
}
  0x33   :  { %55 = dma.hbm_to_vmem [thread:$0]  %s663_s5, 256, %s50_s18, [#allocation6], %s528_s11, %s528_s11, %s529_s12  }
  0x34   :  { %s532_s16 = smov [#allocation8]   ;;  %s475_s21 = scalar_lea.hbm %s664_s6, 16 }
  0x35   :  { %s62_s17 = sshll.u32 %s532_s16, 4  ;;  %p476_p10 = scmp.ne.s32.totalorder %s664_s6, %s475_s21  ;;  %s63_s17 = int_to_ptr.vmem [resolvable:$true] %s62_s17 }
  0x36   :  { %p479_p11 = scmp.lt.u32.totalorder %s475_s21, %s664_s6 }
  0x38   :  { %p481_p12 = pnand %p479_p11, %p476_p10 }
  0x3a   :  { %484 = shalt.err (!%p481_p12)
}
  0x3b   :  { %s485_s1 = scalar_lea.vmem %s63_s17, 16  ;;  %s489_s5 = scalar_lea.vmem %s63_s17, 32 }
  0x3c   :  { %p486_p13 = scmp.ne.s32.totalorder %s63_s17, %s485_s1  ;;  %p490_p0 = scmp.lt.s32.totalorder %s63_s17, %s63_s17 }
  0x3d   :  { %p491_p1 = scmp.lt.s32.totalorder %s489_s5, %s485_s1 }
  0x3f   :  { %p492_p2 = por %p491_p1, %p490_p0 }
  0x41   :  { %p493_p3 = pnand %p492_p2, %p486_p13 }
  0x43   :  { %496 = shalt.err (!%p493_p3)
}
  0x44   :  { %65 = dma.hbm_to_vmem [thread:$0]  %s664_s6, 16, %s63_s17, [#allocation9]  }
  0x45   :  { %519 = dma.done.wait [#allocation3], 128  }
  0x46   :  { %520 = vsyncadd [#allocation3], 4294967168 }
  0x47   :  { %521 = dma.done.wait [#allocation6], 512  }
  0x48   :  { %522 = vsyncadd [#allocation6], 4294966784 }
  0x49   :  { %523 = dma.done.wait [#allocation9], 16  }
  0x4a   :  { %524 = vsyncadd [#allocation9], 4294967280  ;;  %v533_v0 = vmov 0.0|0.0   ;;  %vm534_vm0 = vmmov 0   ;;  %v535_v1 = vmov 0.0   ;;  %vm92_vm1 = vcmask 1040384  }
  0x4b   :  { %388 = vmatprep.subr.bf16.mxu0 %v533_v0  ;;  %392 = vmatprep.subr.bf16.mxu1 %v533_v0  ;;  %v79_v2 = vld [vmem:[#allocation5] sm:$0xff]  ;;  %v80_v3 = vld [vmem:[#allocation5 + $0x8] sm:$0x1]  ;;  %vm536_vm2 = vmmov 1   ;;  %v78_v5 = vld [vmem:[#allocation2] sm:$0xff]  ;;  %vm88_vm4 = vcmask 72704  }
  0x4c   :  { %371 = vmatprep.mubr.msk.f32.mxu0 %vm534_vm0, %v535_v1  ;;  %378 = vmatprep.mubr.msk.f32.mxu1 %vm534_vm0, %v535_v1  ;;  %vm390_vm3 = vmpackc.low %vm92_vm1, %vm536_vm2  ;;  %v389_v4 = vpack.c.bf16 %v80_v3, %v79_v2  ;;  %v167_v6 = vld [vmem:[%s661_s3] sm:$0xff]  ;;  %v168_v7 = vld [vmem:[%s661_s3 + $0x8] sm:$0xff]  ;;  %vm176_vm5 = vcmask 130048  }
  0x4d   :  { %v393_v8 = vpack.c.bf16 %v168_v7, %v167_v6  ;;  %v351_v9 = vld [vmem:[%s660_s2] ss:$0 sm:$0xff]  ;;  %v251_v14 = vld [vmem:[#allocation7] sm:$0xff]  ;;  %v252_v15 = vld [vmem:[#allocation7 + $0x8] sm:$0xff]  ;;  %s537_s2 = smov [#allocation10]  }
  0x4e   :  { %391 = vmatpush3.bf16.msk.msra.mxu0 %vm390_vm3, %v389_v4  ;;  %v396_v16 = vpack.c.bf16 %v252_v15, %v251_v14  ;;  %v354_v17 = vld [vmem:[%s662_s4] ss:$0 sm:$0xff]  ;;  %v356_v22 = vld [vmem:[#allocation8] ss:$0 sm:$0xff]  ;;  %s340_s3 = sshll.u32 %s537_s2, 4  ;;  %s341_s3 = int_to_ptr.vmem [resolvable:$true] %s340_s3 }
  0x4f   :  { %395 = vmatprep.subr.bf16.mxu0 %v533_v0  ;;  %394 = vmatpush3.bf16.msra.mxu1 %v393_v8  ;;  %s497_s9 = scalar_lea.vmem %s341_s3, 128  ;;  %p502_p5 = scmp.lt.s32.totalorder %s341_s3, %s341_s3 }
  0x50   :  { %p498_p4 = scmp.ne.s32.totalorder %s341_s3, %s497_s9  ;;  %p503_p6 = scmp.lt.s32.totalorder %s497_s9, %s497_s9 }
  0x51   :  { %372 = vmatmul.mubr.msk.f32.vlgmr.msra.gmra.mrb[0].mxu0 %vm88_vm4, %v78_v5 }
  0x52   :  { %385 = vmatprep.mubr.msk.f32.mxu0 %vm534_vm0, %v535_v1  ;;  %397 = vmatpush3.bf16.msra.mxu0 %v396_v16  ;;  %p504_p7 = por %p503_p6, %p502_p5 }
  0x54   :  { %p505_p8 = pnand %p504_p7, %p498_p4 }
 0x124   :  { %v162_v10 = vpop.f32.mrb[0].mxu0 }
 0x125   :  { %v163_v11 = vadd.f32 %v351_v9, %v162_v10  ;;  %v373_v12 = vpop.f32.mrb[1].mxu0 }
 0x127   :  { %v166_v13 = vmax.f32 %v163_v11, 0.0 }
 0x129   :  { %379 = vmatmul.mubr.msk.f32.vlgmr.msra.gmra.mrb[0].mxu1 %vm176_vm5, %v166_v13 }
 0x1fc   :  { %v246_v18 = vpop.f32.mrb[0].mxu1 }
 0x1fd   :  { %v247_v19 = vadd.f32 %v354_v17, %v246_v18  ;;  %v380_v20 = vpop.f32.mrb[1].mxu1 }
 0x1ff   :  { %v250_v21 = vmax.f32 %v247_v19, 0.0 }
 0x201   :  { %386 = vmatmul.mubr.msk.f32.vlgmr.msra.gmra.mrb[2].mxu0 %vm176_vm5, %v250_v21 }
 0x2d4   :  { %v329_v23 = vpop.f32.mrb[2].mxu0 }
 0x2d5   :  { %v330_v24 = vadd.f32 %v356_v22, %v329_v23  ;;  %v387_v25 = vpop.f32.mrb[3].mxu0 }
 0x2d7   :  { %333 = vst.msk [vmem:[#allocation10] sm:$0xff] %vm88_vm4, %v330_v24 }
 0x2d8   :  { %508 = shalt.err (!%p505_p8)
}
 0x2d9   :  { %s509_s13 = scalar_lea.hbm %s665_s7, 128 }
 0x2da   :  { %p510_p9 = scmp.ne.s32.totalorder %s665_s7, %s509_s13  ;;  %p513_p10 = scmp.lt.u32.totalorder %s509_s13, %s665_s7 }
 0x2dc   :  { %p515_p11 = pnand %p513_p10, %p510_p9 }
 0x2de   :  { %518 = shalt.err (!%p515_p11)
}
 0x2df   :  { %343 = dma.vmem_to_hbm [thread:$0]  %s341_s3, 128, %s665_s7, [#allocation4]  }
 0x2e0   :  { %525 = dma.done.wait [#allocation4], 128  }
 0x2e1   :  { %526 = vsyncadd [#allocation4], 4294967168 }
 0x2e2   :  { %347 = vsyncpa [#allocation3], 1 }
 0x2e3   :  { %348 = vsyncpa [#allocation6], 1 }
 0x2e4   :  { %349 = vsyncpa [#allocation9], 1 }
 0x2e5   :  { %350 = vsyncpa [#allocation4], 1 }

</bundles_post_ra>
